<compile_context>
chip_gen: v7x
topology: tpu7x:2x2x1
jax: 0.10.0
libtpu: 0.0.40
codegen_flags: <defaults>
</compile_context>

<pallas_src>
import functools

import jax
import jax.numpy as jnp
from jax.experimental import pallas as pl
from jax.experimental.pallas import tpu as pltpu


H1, H2, OUT = 5, 2, 2   # hidden / output widths of the module


def _vpu_linear(h, w_smem, b_smem, out_rows, in_rows):
    """out[j, :] = b[j] + sum_k w[j, k] * h[k, :] as VPU broadcast-MACs."""
    rows = []
    for j in range(out_rows):
        acc = h[0:1, :] * w_smem[j, 0]
        for k in range(1, in_rows):
            acc = acc + h[k:k + 1, :] * w_smem[j, k]
        rows.append(acc + b_smem[j, 0])
    return jnp.concatenate(rows, axis=0)


def mlp_kernel(x_ref, w1_ref, b1_ref, w2_ref, b2_ref, w3_ref, b3_ref, o_ref):
    # Layer 1 on the MXU: [5, in] @ [in, TILE_B] -> [5, TILE_B].
    # N (= batch tile) is lane-dense, so result stores are full-lane stores.
    h1 = jnp.dot(w1_ref[...], x_ref[...], preferred_element_type=jnp.float32)
    h1 = jnp.maximum(h1 + b1_ref[...], 0.0)           # bias: per-sublane const

    # Layers 2 & 3 (5->2, 2->2) as VPU broadcast-MACs from SMEM scalars:
    # avoids two tiny dependent MXU round trips on the critical path.
    h2 = jnp.maximum(_vpu_linear(h1, w2_ref, b2_ref, H2, H1), 0.0)
    out = _vpu_linear(h2, w3_ref, b3_ref, OUT, H2)

    o_ref[...] = out.astype(o_ref.dtype)


@functools.partial(jax.jit, static_argnames=("tile_b",))
def neural_net_forward(x, params, *, tile_b=512):
    """x: [batch, input_size] f32.
    params (PyTorch [out,in] weight layout): w1[5,in], b1[5,1], w2[2,5],
    b2[2,1], w3[2,2], b3[2,1]."""
    w1, b1 = params["w1"], params["b1"]
    w2, b2 = params["w2"], params["b2"]
    w3, b3 = params["w3"], params["b3"]

    batch, input_size = x.shape
    assert tile_b % 128 == 0, "tile_b must be lane-dense (multiple of 128)"

    # Pad batch to a multiple of the tile so the lane axis tiles cleanly.
    num_tiles = pl.cdiv(batch, tile_b)
    padded = num_tiles * tile_b
    if padded != batch:
        x = jnp.pad(x, ((0, padded - batch), (0, 0)))

    xT = x.T                                   # [input_size, padded], lane-dense

    grid_spec = pltpu.PrefetchScalarGridSpec(
        num_scalar_prefetch=0,
        grid=(num_tiles,),
        in_specs=[
            # activations: a new batch tile each grid step (double-buffered DMA)
            pl.BlockSpec((input_size, tile_b), lambda i: (0, i)),
            # layer-1 weights & bias: VMEM-resident (same block for every i)
            pl.BlockSpec((H1, input_size), lambda i: (0, 0)),
            pl.BlockSpec((H1, 1), lambda i: (0, 0)),
            # tiny layer-2/3 params live in SMEM (scalar broadcast-MAC source)
            pl.BlockSpec(memory_space=pltpu.MemorySpace.SMEM),
            pl.BlockSpec(memory_space=pltpu.MemorySpace.SMEM),
            pl.BlockSpec(memory_space=pltpu.MemorySpace.SMEM),
            pl.BlockSpec(memory_space=pltpu.MemorySpace.SMEM),
        ],
        out_specs=pl.BlockSpec((OUT, tile_b), lambda i: (0, i)),
    )

    outT = pl.pallas_call(
        mlp_kernel,
        out_shape=jax.ShapeDtypeStruct((OUT, padded), jnp.float32),
        grid_spec=grid_spec,
        compiler_params=pltpu.CompilerParams(
            dimension_semantics=("parallel",),   # shard batch tiles across TCs
        ),
    )(xT, w1, b1, w2, b2, w3, b3)

    return outT.T[:batch]                        # back to [batch, 2]


def init_params(key, input_size):
    """Deterministic init mimicking nn.Linear's U(-1/sqrt(fan_in), 1/sqrt(fan_in)),
    stored in PyTorch [out_features, in_features] layout."""
    dims = [(input_size, H1), (H1, H2), (H2, OUT)]
    params = {}
    for idx, (fan_in, fan_out) in enumerate(dims, start=1):
        key, kw, kb = jax.random.split(key, 3)
        bound = 1.0 / jnp.sqrt(float(fan_in))
        params[f"w{idx}"] = jax.random.uniform(
            kw, (fan_out, fan_in), jnp.float32, minval=-bound, maxval=bound)
        params[f"b{idx}"] = jax.random.uniform(
            kb, (fan_out, 1), jnp.float32, minval=-bound, maxval=bound)
    return params


if __name__ == "__main__":
    key = jax.random.PRNGKey(0)
    k_x, k_p = jax.random.split(key)

    # Small but grid-exercising shapes: batch pads 300 -> 384 (3 tiles of 128).
    batch, input_size = 300, 32
    x = jax.random.normal(k_x, (batch, input_size), dtype=jnp.float32)
    params = init_params(k_p, input_size)

    out = neural_net_forward(x, params, tile_b=128)
    jax.block_until_ready(out)

    # plain-JAX reference in the standard [batch, feature] layout
    h1 = jnp.maximum(x @ params["w1"].T + params["b1"].T, 0.0)
    h2 = jnp.maximum(h1 @ params["w2"].T + params["b2"].T, 0.0)
    ref = h2 @ params["w3"].T + params["b3"].T

    assert out.shape == (batch, OUT)
    assert jnp.allclose(out, ref, atol=1e-5), "mismatch vs reference"

    print("KERNEL_OK")
</pallas_src>

<mosaic_0001>
module attributes {stable_mosaic.version = 11 : i64} {
  func.func @mlp_kernel(%arg0: i32, %arg1: memref<32x128xf32, #tpu.memory_space<vmem>>, %arg2: memref<5x32xf32, #tpu.memory_space<vmem>>, %arg3: memref<5x1xf32, #tpu.memory_space<vmem>>, %arg4: memref<2x5xf32, #tpu.memory_space<smem>>, %arg5: memref<2x1xf32, #tpu.memory_space<smem>>, %arg6: memref<2x2xf32, #tpu.memory_space<smem>>, %arg7: memref<2x1xf32, #tpu.memory_space<smem>>, %arg8: memref<2x128xf32, #tpu.memory_space<vmem>>) attributes {dimension_semantics = [#tpu.dimension_semantics<parallel>], iteration_bounds = array<i64: 3>, scalar_prefetch = 0 : i64, scratch_operands = 0 : i64, tpu.core_type = #tpu.core_type<tc>, window_params = [{transform_indices = @transform_0, window_bounds = array<i64: 32, 128>}, {pipeline_mode = #tpu.pipeline_mode<synchronous>, transform_indices = @transform_1, window_bounds = array<i64: 5, 32>}, {pipeline_mode = #tpu.pipeline_mode<synchronous>, transform_indices = @transform_2, window_bounds = array<i64: 5, 1>}, {transform_indices = @transform_3, window_bounds = array<i64: 2, 5>}, {transform_indices = @transform_4, window_bounds = array<i64: 2, 1>}, {transform_indices = @transform_5, window_bounds = array<i64: 2, 2>}, {transform_indices = @transform_6, window_bounds = array<i64: 2, 1>}, {transform_indices = @transform_7, window_bounds = array<i64: 2, 128>}]} {
    %c0 = arith.constant 0 : index
    %c0_0 = arith.constant 0 : index
    %0 = vector.load %arg2[%c0, %c0_0] : memref<5x32xf32, #tpu.memory_space<vmem>>, vector<5x32xf32>
    %c0_1 = arith.constant 0 : index
    %c0_2 = arith.constant 0 : index
    %1 = vector.load %arg1[%c0_1, %c0_2] : memref<32x128xf32, #tpu.memory_space<vmem>>, vector<32x128xf32>
    %cst = arith.constant dense<0.000000e+00> : vector<5x128xf32>
    %2 = tpu.matmul %0, %1, %cst {dimension_numbers = #tpu.dot_dimension_numbers<[1], [0], [0], [1], [0, 0, 1, 1], [], []>} : vector<5x32xf32>, vector<32x128xf32>, vector<5x128xf32> -> vector<5x128xf32>
    %c0_3 = arith.constant 0 : index
    %c0_4 = arith.constant 0 : index
    %3 = vector.load %arg3[%c0_3, %c0_4] : memref<5x1xf32, #tpu.memory_space<vmem>>, vector<5x1xf32>
    %4 = vector.broadcast %3 : vector<5x1xf32> to vector<5x128xf32>
    %5 = arith.addf %2, %4 : vector<5x128xf32>
    %cst_5 = arith.constant 0.000000e+00 : f32
    %6 = vector.broadcast %cst_5 : f32 to vector<5x128xf32>
    %7 = arith.maximumf %5, %6 : vector<5x128xf32>
    %8 = vector.extract_strided_slice %7 {offsets = [0, 0], sizes = [1, 128], strides = [1, 1]} : vector<5x128xf32> to vector<1x128xf32>
    %c0_6 = arith.constant 0 : index
    %c0_7 = arith.constant 0 : index
    %9 = memref.load %arg4[%c0_6, %c0_7] : memref<2x5xf32, #tpu.memory_space<smem>>
    %10 = vector.broadcast %9 : f32 to vector<1x128xf32>
    %11 = arith.mulf %8, %10 : vector<1x128xf32>
    %12 = vector.extract_strided_slice %7 {offsets = [1, 0], sizes = [1, 128], strides = [1, 1]} : vector<5x128xf32> to vector<1x128xf32>
    %c0_8 = arith.constant 0 : index
    %c1 = arith.constant 1 : index
    %13 = memref.load %arg4[%c0_8, %c1] : memref<2x5xf32, #tpu.memory_space<smem>>
    %14 = vector.broadcast %13 : f32 to vector<1x128xf32>
    %15 = arith.mulf %12, %14 : vector<1x128xf32>
    %16 = arith.addf %11, %15 : vector<1x128xf32>
    %17 = vector.extract_strided_slice %7 {offsets = [2, 0], sizes = [1, 128], strides = [1, 1]} : vector<5x128xf32> to vector<1x128xf32>
    %c0_9 = arith.constant 0 : index
    %c2 = arith.constant 2 : index
    %18 = memref.load %arg4[%c0_9, %c2] : memref<2x5xf32, #tpu.memory_space<smem>>
    %19 = vector.broadcast %18 : f32 to vector<1x128xf32>
    %20 = arith.mulf %17, %19 : vector<1x128xf32>
    %21 = arith.addf %16, %20 : vector<1x128xf32>
    %22 = vector.extract_strided_slice %7 {offsets = [3, 0], sizes = [1, 128], strides = [1, 1]} : vector<5x128xf32> to vector<1x128xf32>
    %c0_10 = arith.constant 0 : index
    %c3 = arith.constant 3 : index
    %23 = memref.load %arg4[%c0_10, %c3] : memref<2x5xf32, #tpu.memory_space<smem>>
    %24 = vector.broadcast %23 : f32 to vector<1x128xf32>
    %25 = arith.mulf %22, %24 : vector<1x128xf32>
    %26 = arith.addf %21, %25 : vector<1x128xf32>
    %27 = vector.extract_strided_slice %7 {offsets = [4, 0], sizes = [1, 128], strides = [1, 1]} : vector<5x128xf32> to vector<1x128xf32>
    %c0_11 = arith.constant 0 : index
    %c4 = arith.constant 4 : index
    %28 = memref.load %arg4[%c0_11, %c4] : memref<2x5xf32, #tpu.memory_space<smem>>
    %29 = vector.broadcast %28 : f32 to vector<1x128xf32>
    %30 = arith.mulf %27, %29 : vector<1x128xf32>
    %31 = arith.addf %26, %30 : vector<1x128xf32>
    %c0_12 = arith.constant 0 : index
    %c0_13 = arith.constant 0 : index
    %32 = memref.load %arg5[%c0_12, %c0_13] : memref<2x1xf32, #tpu.memory_space<smem>>
    %33 = vector.broadcast %32 : f32 to vector<1x128xf32>
    %34 = arith.addf %31, %33 : vector<1x128xf32>
    %35 = vector.extract_strided_slice %7 {offsets = [0, 0], sizes = [1, 128], strides = [1, 1]} : vector<5x128xf32> to vector<1x128xf32>
    %c1_14 = arith.constant 1 : index
    %c0_15 = arith.constant 0 : index
    %36 = memref.load %arg4[%c1_14, %c0_15] : memref<2x5xf32, #tpu.memory_space<smem>>
    %37 = vector.broadcast %36 : f32 to vector<1x128xf32>
    %38 = arith.mulf %35, %37 : vector<1x128xf32>
    %39 = vector.extract_strided_slice %7 {offsets = [1, 0], sizes = [1, 128], strides = [1, 1]} : vector<5x128xf32> to vector<1x128xf32>
    %c1_16 = arith.constant 1 : index
    %c1_17 = arith.constant 1 : index
    %40 = memref.load %arg4[%c1_16, %c1_17] : memref<2x5xf32, #tpu.memory_space<smem>>
    %41 = vector.broadcast %40 : f32 to vector<1x128xf32>
    %42 = arith.mulf %39, %41 : vector<1x128xf32>
    %43 = arith.addf %38, %42 : vector<1x128xf32>
    %44 = vector.extract_strided_slice %7 {offsets = [2, 0], sizes = [1, 128], strides = [1, 1]} : vector<5x128xf32> to vector<1x128xf32>
    %c1_18 = arith.constant 1 : index
    %c2_19 = arith.constant 2 : index
    %45 = memref.load %arg4[%c1_18, %c2_19] : memref<2x5xf32, #tpu.memory_space<smem>>
    %46 = vector.broadcast %45 : f32 to vector<1x128xf32>
    %47 = arith.mulf %44, %46 : vector<1x128xf32>
    %48 = arith.addf %43, %47 : vector<1x128xf32>
    %49 = vector.extract_strided_slice %7 {offsets = [3, 0], sizes = [1, 128], strides = [1, 1]} : vector<5x128xf32> to vector<1x128xf32>
    %c1_20 = arith.constant 1 : index
    %c3_21 = arith.constant 3 : index
    %50 = memref.load %arg4[%c1_20, %c3_21] : memref<2x5xf32, #tpu.memory_space<smem>>
    %51 = vector.broadcast %50 : f32 to vector<1x128xf32>
    %52 = arith.mulf %49, %51 : vector<1x128xf32>
    %53 = arith.addf %48, %52 : vector<1x128xf32>
    %54 = vector.extract_strided_slice %7 {offsets = [4, 0], sizes = [1, 128], strides = [1, 1]} : vector<5x128xf32> to vector<1x128xf32>
    %c1_22 = arith.constant 1 : index
    %c4_23 = arith.constant 4 : index
    %55 = memref.load %arg4[%c1_22, %c4_23] : memref<2x5xf32, #tpu.memory_space<smem>>
    %56 = vector.broadcast %55 : f32 to vector<1x128xf32>
    %57 = arith.mulf %54, %56 : vector<1x128xf32>
    %58 = arith.addf %53, %57 : vector<1x128xf32>
    %c1_24 = arith.constant 1 : index
    %c0_25 = arith.constant 0 : index
    %59 = memref.load %arg5[%c1_24, %c0_25] : memref<2x1xf32, #tpu.memory_space<smem>>
    %60 = vector.broadcast %59 : f32 to vector<1x128xf32>
    %61 = arith.addf %58, %60 : vector<1x128xf32>
    %62 = tpu.concatenate %34, %61 in 0 : vector<1x128xf32>, vector<1x128xf32> -> vector<2x128xf32>
    %cst_26 = arith.constant 0.000000e+00 : f32
    %63 = vector.broadcast %cst_26 : f32 to vector<2x128xf32>
    %64 = arith.maximumf %62, %63 : vector<2x128xf32>
    %65 = vector.extract_strided_slice %64 {offsets = [0, 0], sizes = [1, 128], strides = [1, 1]} : vector<2x128xf32> to vector<1x128xf32>
    %c0_27 = arith.constant 0 : index
    %c0_28 = arith.constant 0 : index
    %66 = memref.load %arg6[%c0_27, %c0_28] : memref<2x2xf32, #tpu.memory_space<smem>>
    %67 = vector.broadcast %66 : f32 to vector<1x128xf32>
    %68 = arith.mulf %65, %67 : vector<1x128xf32>
    %69 = vector.extract_strided_slice %64 {offsets = [1, 0], sizes = [1, 128], strides = [1, 1]} : vector<2x128xf32> to vector<1x128xf32>
    %c0_29 = arith.constant 0 : index
    %c1_30 = arith.constant 1 : index
    %70 = memref.load %arg6[%c0_29, %c1_30] : memref<2x2xf32, #tpu.memory_space<smem>>
    %71 = vector.broadcast %70 : f32 to vector<1x128xf32>
    %72 = arith.mulf %69, %71 : vector<1x128xf32>
    %73 = arith.addf %68, %72 : vector<1x128xf32>
    %c0_31 = arith.constant 0 : index
    %c0_32 = arith.constant 0 : index
    %74 = memref.load %arg7[%c0_31, %c0_32] : memref<2x1xf32, #tpu.memory_space<smem>>
    %75 = vector.broadcast %74 : f32 to vector<1x128xf32>
    %76 = arith.addf %73, %75 : vector<1x128xf32>
    %77 = vector.extract_strided_slice %64 {offsets = [0, 0], sizes = [1, 128], strides = [1, 1]} : vector<2x128xf32> to vector<1x128xf32>
    %c1_33 = arith.constant 1 : index
    %c0_34 = arith.constant 0 : index
    %78 = memref.load %arg6[%c1_33, %c0_34] : memref<2x2xf32, #tpu.memory_space<smem>>
    %79 = vector.broadcast %78 : f32 to vector<1x128xf32>
    %80 = arith.mulf %77, %79 : vector<1x128xf32>
    %81 = vector.extract_strided_slice %64 {offsets = [1, 0], sizes = [1, 128], strides = [1, 1]} : vector<2x128xf32> to vector<1x128xf32>
    %c1_35 = arith.constant 1 : index
    %c1_36 = arith.constant 1 : index
    %82 = memref.load %arg6[%c1_35, %c1_36] : memref<2x2xf32, #tpu.memory_space<smem>>
    %83 = vector.broadcast %82 : f32 to vector<1x128xf32>
    %84 = arith.mulf %81, %83 : vector<1x128xf32>
    %85 = arith.addf %80, %84 : vector<1x128xf32>
    %c1_37 = arith.constant 1 : index
    %c0_38 = arith.constant 0 : index
    %86 = memref.load %arg7[%c1_37, %c0_38] : memref<2x1xf32, #tpu.memory_space<smem>>
    %87 = vector.broadcast %86 : f32 to vector<1x128xf32>
    %88 = arith.addf %85, %87 : vector<1x128xf32>
    %89 = tpu.concatenate %76, %88 in 0 : vector<1x128xf32>, vector<1x128xf32> -> vector<2x128xf32>
    %c0_39 = arith.constant 0 : index
    %c0_40 = arith.constant 0 : index
    %90 = vector.load %arg8[%c0_39, %c0_40] : memref<2x128xf32, #tpu.memory_space<vmem>>, vector<2x128xf32>
    tpu.vector_store %arg8[%c0_39, %c0_40], %89 {strides = array<i32>} : memref<2x128xf32, #tpu.memory_space<vmem>>, vector<2x128xf32>,
    return
  }
  func.func @transform_0(%arg0: i32) -> (i32, i32) {
    %c0_i32 = arith.constant 0 : i32
    %c0_i32_0 = arith.constant 0 : i32
    return %c0_i32, %arg0 : i32, i32
  }
  func.func @transform_1(%arg0: i32) -> (i32, i32) {
    %c0_i32 = arith.constant 0 : i32
    %c0_i32_0 = arith.constant 0 : i32
    %c0_i32_1 = arith.constant 0 : i32
    return %c0_i32, %c0_i32_0 : i32, i32
  }
  func.func @transform_2(%arg0: i32) -> (i32, i32) {
    %c0_i32 = arith.constant 0 : i32
    %c0_i32_0 = arith.constant 0 : i32
    %c0_i32_1 = arith.constant 0 : i32
    return %c0_i32, %c0_i32_0 : i32, i32
  }
  func.func @transform_3(%arg0: i32) -> (i32, i32) {
    %c0_i32 = arith.constant 0 : i32
    %c0_i32_0 = arith.constant 0 : i32
    %c0_i32_1 = arith.constant 0 : i32
    return %c0_i32, %c0_i32_0 : i32, i32
  }
  func.func @transform_4(%arg0: i32) -> (i32, i32) {
    %c0_i32 = arith.constant 0 : i32
    %c0_i32_0 = arith.constant 0 : i32
    %c0_i32_1 = arith.constant 0 : i32
    return %c0_i32, %c0_i32_0 : i32, i32
  }
  func.func @transform_5(%arg0: i32) -> (i32, i32) {
    %c0_i32 = arith.constant 0 : i32
    %c0_i32_0 = arith.constant 0 : i32
    %c0_i32_1 = arith.constant 0 : i32
    return %c0_i32, %c0_i32_0 : i32, i32
  }
  func.func @transform_6(%arg0: i32) -> (i32, i32) {
    %c0_i32 = arith.constant 0 : i32
    %c0_i32_0 = arith.constant 0 : i32
    %c0_i32_1 = arith.constant 0 : i32
    return %c0_i32, %c0_i32_0 : i32, i32
  }
  func.func @transform_7(%arg0: i32) -> (i32, i32) {
    %c0_i32 = arith.constant 0 : i32
    %c0_i32_0 = arith.constant 0 : i32
    return %c0_i32, %arg0 : i32, i32
  }
}

</mosaic_0001>

<bundles_post_ra>
// kernel: neural_net_forward.1
= control target key start
LH: loop header
LB: loop body
LE: loop exit
PB: predicated region body
PF: predicated region fallthrough
CT: control target
= control target key end

     0   :  { %12 = vsyncpa [#allocation5], 0  ;;  %s1209_s0 = inlined_call_operand.vmem [shape: f32[32,384], index: 0, kind: input, shape index: {}]   ;;  %s1210_s1 = inlined_call_operand.vmem [shape: f32[5,32], index: 1, kind: input, shape index: {}]   ;;  %s1211_s2 = inlined_call_operand.vmem [shape: f32[5,1], index: 2, kind: input, shape index: {}]   ;;  %s1212_s3 = inlined_call_operand.vmem [shape: f32[2,5], index: 3, kind: input, shape index: {}]   ;;  %s1213_s4 = inlined_call_operand.vmem [shape: f32[2,1], index: 4, kind: input, shape index: {}]   ;;  %s1214_s5 = inlined_call_operand.vmem [shape: f32[2,2], index: 5, kind: input, shape index: {}]   ;;  %s1215_s6 = inlined_call_operand.vmem [shape: f32[2,1], index: 6, kind: input, shape index: {}]   ;;  %s1216_s7 = inlined_call_operand.hbm [shape: f32[2,384], index: 7, kind: output, shape index: {}]  }
   0x1   :  { %13 = vsyncpa [#allocation7], 0 }
   0x2   :  { %14 = vsyncpa [#allocation10], 0 }
   0x3   :  { %15 = vsyncpa [#allocation4], 0 }
   0x4   :  { %17 = vsyncpa [#allocation4 + $0x1], 0  ;;  %s1013_s24 = smov 0   ;;  %s1015_s25 = smov 0  }
   0x5   :  { %s1017_s26 = smov 0   ;;  %s1019_s27 = smov 0  }
   0x6 LB: > { %s1034_s28 = sadd.s32 4294967295, %s962_s27   ;;  %s686_s29 = sadd.s32 4294967294, %s962_s27   ;;  %s962_s27 = sphi %s1019_s27, %s1238_s27   ;;  %s958_s26 = sphi %s1017_s26, %s1237_s26   ;;  %s954_s25 = sphi %s1015_s25, %s1236_s25   ;;  %s950_s24 = sphi %s1013_s24, %s1235_s24  }
   0x7   : > { %s1038_s30 = sadd.s32 1, %s962_s27   ;;  %s30_s8 = sadd.s32 1, %s958_s26 }
   0x8   : > { %s27_s9 = ssub.s32 %s962_s27, %s1038_s30  ;;  %p37_p0 = scmp.ne.s32.totalorder %s958_s26, %s954_s25 }
   0x9   : > { %p28_p1 = scmp.eq.s32.totalorder %s27_s9, 0  ;;  %p38_p2 = scmp.eq.s32.totalorder %s962_s27, 0 }
   0xa   : > { %p193_p3 = scmp.eq.s32.totalorder %s1034_s28, 2  ;;  %p198_p4 = scmp.ne.s32.totalorder %s954_s25, %s950_s24 }
   0xb   : > { %s1050_s10 = scalar_select %p28_p1, %s958_s26, %s30_s8  }
   0xc   : > { %p1052_p5 = por %p38_p2, %p37_p0  ;;  %p1056_p6 = por %p193_p3, %p37_p0 }
   0xd   : > { %p199_p7 = scmp.eq.s32.totalorder %s686_s29, 2  ;;  %p687_p8 = scmp.ge.s32.totalorder %s962_s27, 1 }
   0xe   : > { %s1220_s11 = scalar_select %p1052_p5, 1, 0 }
   0xf   : > { %s1221_s12 = scalar_select %p1056_p6, 1, 0 }
  0x10   : > { %p206_p9 = scmp.lt.s32.totalorder %s962_s27, 4  ;;  %p1062_p10 = por %p199_p7, %p198_p4 }
  0x11   : > { %p1217_p11 = scmp.eq.s32.totalorder %s1034_s28, 0  ;;  %s236_s17 = sshll.u32 %s1213_s4, 4  ;;  %s237_s17 = int_to_ptr.vmem [resolvable:$true] %s236_s17 }
  0x12   : > { %s1222_s13 = scalar_select %p1062_p10, 1, 0 }
  0x13   : > { %p1067_p12 = pnand %p687_p8, %p206_p9  ;;  %s225_s20 = sshll.u32 %s1212_s3, 4  ;;  %s226_s20 = int_to_ptr.vmem [resolvable:$true] %s225_s20 }
  0x14   : > { %s247_s29 = sshll.u32 %s1214_s5, 4  ;;  %s258_s15 = sshll.u32 %s1215_s6, 4  ;;  %s1088_s29 = int_to_ptr.vmem [resolvable:$true] %s247_s29  ;;  %s259_s15 = int_to_ptr.vmem [resolvable:$true] %s258_s15 }
  0x15   : > { %s1223_s14 = scalar_select %p1067_p12, 1, 0 }
  0x16   : > { %p761_p13 = pneg %p1067_p12  ;;  %s828_s16 = scalar_lea.vmem %s237_s17, 32 }
  0x17   : > { %p829_p1 = scmp.ne.s32.totalorder %s237_s17, %s828_s16  ;;  %p836_p7 = scmp.lt.s32.totalorder %s237_s17, %s237_s17 }
  0x18   : > { %p1081_p0 = pnand %p1217_p11, %p761_p13  ;;  %p837_p8 = scmp.lt.s32.totalorder %s828_s16, %s828_s16 }
  0x1a   : > { %p830_p2 = pneg %p1081_p0  ;;  %p838_p9 = por %p837_p8, %p836_p7 }
  0x1c   : > { %p831_p3 = pnand %p830_p2, %p829_p1 }
  0x1e   : > { %p832_p4 = pneg %p831_p3 }
  0x20   : > { %p839_p13 = pnand %p838_p9, %p832_p4 }
  0x22   : > { %842 = shalt.err (!%p839_p13)
}
  0x23   : > { %s964_s18 = smov [#allocation6]   ;;  %s843_s19 = scalar_lea.vmem %s226_s20, 32 }
  0x24   : > { %767 = dma.vmem_to_smem (!%p1081_p0), %s237_s17, 32, %s964_s18, [#allocation7]  }
  0x25   : > { %p844_p11 = scmp.ne.s32.totalorder %s226_s20, %s843_s19  ;;  %p851_p12 = scmp.lt.s32.totalorder %s226_s20, %s226_s20 }
  0x26   : > { %p852_p5 = scmp.lt.s32.totalorder %s843_s19, %s843_s19 }
  0x27   : > { %p846_p10 = pnand %p844_p11, %p830_p2 }
  0x28   : > { %p853_p1 = por %p852_p5, %p851_p12 }
  0x29   : > { %p847_p6 = pneg %p846_p10 }
  0x2b   : > { %p854_p3 = pnand %p853_p1, %p847_p6 }
  0x2d   : > { %857 = shalt.err (!%p854_p3)
}
  0x2e   : > { %s965_s22 = smov [#allocation3]   ;;  %s858_s17 = scalar_lea.vmem %s1088_s29, 32 }
  0x2f   : > { %764 = dma.vmem_to_smem (!%p1081_p0), %s226_s20, 32, %s965_s22, [#allocation5]  }
  0x30   : > { %p859_p4 = scmp.ne.s32.totalorder %s1088_s29, %s858_s17  ;;  %p866_p10 = scmp.lt.s32.totalorder %s1088_s29, %s1088_s29 }
  0x31   : > { %p867_p8 = scmp.lt.s32.totalorder %s858_s17, %s858_s17 }
  0x32   : > { %p861_p7 = pnand %p859_p4, %p830_p2 }
  0x33   : > { %p868_p5 = por %p867_p8, %p866_p10 }
  0x34   : > { %p862_p11 = pneg %p861_p7 }
  0x36   : > { %p869_p6 = pnand %p868_p5, %p862_p11 }
  0x38   : > { %872 = shalt.err (!%p869_p6)
}
  0x39   : > { %s966_s23 = smov [#allocation8]   ;;  %s873_s9 = scalar_lea.vmem %s259_s15, 32 }
  0x3a   : > { %770 = dma.vmem_to_smem (!%p1081_p0), %s1088_s29, 32, %s966_s23, [#allocation7]  }
  0x3b   : > { %p874_p12 = scmp.ne.s32.totalorder %s259_s15, %s873_s9  ;;  %p881_p1 = scmp.lt.s32.totalorder %s259_s15, %s259_s15 }
  0x3c   : > { %p882_p3 = scmp.lt.s32.totalorder %s873_s9, %s873_s9 }
  0x3d   : > { %p876_p9 = pnand %p874_p12, %p830_p2 }
  0x3e   : > { %p883_p4 = por %p882_p3, %p881_p1 }
  0x3f   : > { %p877_p13 = pneg %p876_p9 }
  0x41   : > { %p884_p7 = pnand %p883_p4, %p877_p13 }
  0x43   : > { %887 = shalt.err (!%p884_p7)
}
  0x44   : > { %s967_s16 = smov [#allocation9]   ;;  %p692_p11 = scmp.ge.s32.totalorder %s962_s27, 3 }
  0x45   : > { %773 = dma.vmem_to_smem (!%p1081_p0), %s259_s15, 32, %s967_s16, [#allocation10]  }
  0x46   : > { %265 = sbr.rel (%p692_p11) target bundleno = 84 (0x54), region = 40  ;;  %p1225_p10 = scmp.ne.s32.totalorder (!%p692_p11), %s1220_s11, 0 }
  0x4d   : > { %268 = sbr.rel (!%p1225_p10) target bundleno = 84 (0x54), region = 44  ;;  %s270_s29 = sand.u32 (%p1225_p10), 1, %s958_s26  }
  0x4e   : > { %s694_s18 = sshll.u32 (%p1225_p10), %s962_s27, 3  ;;  %s693_s19 = sshll.u32 (%p1225_p10), %s270_s29, 5 }
  0x4f   : > { %s274_s23 = scalar_lea.vmem (%p1225_p10), %s1209_s0, %s694_s18  ;;  %s272_s21 = scalar_lea.vmem (%p1225_p10), [#allocation2], %s693_s19 }
  0x50   : > { %v308_v0 = vld [vmem:[%s274_s23] sm:$0xff] (%p1225_p10)  ;;  %v310_v1 = vld [vmem:[%s274_s23 + $0x18] sm:$0xff] (%p1225_p10)  ;;  %v312_v2 = vld [vmem:[%s274_s23 + $0x30] sm:$0xff] (%p1225_p10) }
  0x51   : > { %309 = vst [vmem:[%s272_s21] sm:$0xff] (%p1225_p10), %v308_v0  ;;  %311 = vst [vmem:[%s272_s21 + $0x8] sm:$0xff] (%p1225_p10), %v310_v1  ;;  %v314_v3 = vld [vmem:[%s274_s23 + $0x48] sm:$0xff] (%p1225_p10) }
  0x52   : > { %313 = vst [vmem:[%s272_s21 + $0x10] sm:$0xff] (%p1225_p10), %v312_v2  ;;  %315 = vst [vmem:[%s272_s21 + $0x18] sm:$0xff] (%p1225_p10), %v314_v3 }
  0x54 PF: > { %p1226_p0 = scmp.ne.s32.totalorder %s1223_s14, 0 }
  0x55   : > { %s1135_s11 = sand.u32 (!%p1226_p0), 1, %s954_s25   ;;  %p1227_p2 = scmp.eq.s32.totalorder (!%p1226_p0), %s1034_s28, 0 }
  0x56   : > { %324 = sbr.rel (%p1226_p0) target bundleno = 373 (0x175), region = 82  ;;  %s696_s15 = sshll.u32 (!%p1226_p0), %s1135_s11, 5 }
  0x57   : > { %s329_s8 = scalar_lea.vmem (!%p1226_p0), [#allocation2], %s696_s15 }
  0x5d   : > { %933 = dma.done.wait (%p1227_p2), [#allocation5], 32   ;;  %p1228_p8 = pmov %p1227_p2 }
  0x5e   : > { %p1229_p5 = pmov %p1227_p2 }
  0x5f   : > { %935 = vsyncadd (%p1228_p8), [#allocation5], 4294967264 }
  0x60   : > { %937 = dma.done.wait (%p1229_p5), [#allocation7], 64   ;;  %p1230_p6 = pmov %p1227_p2 }
  0x61   : > { %p1231_p12 = pmov %p1227_p2 }
  0x62   : > { %939 = vsyncadd (%p1230_p6), [#allocation7], 4294967232 }
  0x63   : > { %941 = dma.done.wait (%p1231_p12), [#allocation10], 32   ;;  %p1232_p9 = pmov %p1227_p2 }
  0x65   : > { %943 = vsyncadd (%p1232_p9), [#allocation10], 4294967264 }
  0x66   : > { %349 = sfence }
  0x67   : > { %v376_v4 = vld [vmem:[%s329_s8] sm:$0xff]  ;;  %v377_v5 = vld [vmem:[%s329_s8 + $0x8] sm:$0xff]  ;;  %v378_v6 = vld [vmem:[%s329_s8 + $0x10] sm:$0xff]  ;;  %v968_v7 = vmov 0.0|0.0   ;;  %vm969_vm0 = vmmov 0   ;;  %v970_v10 = vmov 0.0  }
  0x68   : > { %737 = vmatprep.subr.bf16.mxu0 %v968_v7  ;;  %v738_v8 = vpack.c.bf16 %v377_v5, %v376_v4  ;;  %v379_v9 = vld [vmem:[%s329_s8 + $0x18] sm:$0xff]  ;;  %734 = vmatprep.mubr.msk.f32.mxu0 %vm969_vm0, %v970_v10  ;;  %v971_v11 = vmov 0   ;;  %v380_v12 = vld [vmem:[%s1211_s2] sm:$0x1f]  ;;  %vm386_vm1 = vcmask 261120   ;;  %s703_s29 = sld [smem:[#allocation3 + $0x1]] }
  0x69   : > { %827 = vset.pattern.permute.xlu0 %v971_v11  ;;  %v741_v13 = vpack.c.bf16 %v379_v9, %v378_v6  ;;  %v375_v14 = vld [vmem:[%s1210_s1] sm:$0x1f]  ;;  %s704_s18 = sld [smem:[#allocation3 + $0x2]]  ;;  %s708_s19 = sld [smem:[#allocation3 + $0x81]]  ;;  %vm532_vm2 = vcmask 1040384  }
  0x6a   : > { %739 = vmatpush3.bf16.msra.mxu0 %v738_v8  ;;  %383 = vperm.xlu0 %827, %v380_v12   ;;  %s709_s22 = sld [smem:[#allocation3 + $0x82]]  ;;  %s461_s17 = sld [smem:[#allocation3]] }
  0x6b   : > { %740 = vmatprep.subr.bf16.mxu0 %v968_v7  ;;  %s705_s23 = sld [smem:[#allocation3 + $0x3]]  ;;  %s707_s21 = sld [smem:[#allocation3 + $0x80]] }
  0x6c   : > { %s710_s15 = sld [smem:[#allocation3 + $0x83]]  ;;  %s706_s8 = sld [smem:[#allocation3 + $0x4]] }
  0x6d   : > { %s1156_s14 = sld [smem:[#allocation3 + $0x84]]  ;;  %s712_s20 = sld [smem:[#allocation6 + $0x80]] }
  0x6e   : > { %742 = vmatpush3.bf16.msra.mxu0 %v741_v13  ;;  %v465_v19 = vstv %s703_s29  ;;  %s492_s9 = sld [smem:[#allocation6]]  ;;  %s713_s16 = sld [smem:[#allocation8 + $0x1]] }
  0x6f   : > { %v472_v20 = vstv %s704_s18  ;;  %v499_v22 = vstv %s708_s19  ;;  %s715_s29 = sld [smem:[#allocation8 + $0x81]]  ;;  %s535_s18 = sld [smem:[#allocation8]] }
  0x70   : > { %v506_v23 = vstv %s709_s22  ;;  %v462_v24 = vstv %s461_s17  ;;  %s714_s19 = sld [smem:[#allocation8 + $0x80]]  ;;  %p1233_p1 = scmp.ne.s32.totalorder %s1221_s12, 0 }
  0x71   : > { %735 = vmatmul.mubr.msk.f32.vlgmr.msra.gmra.mrb[0].mxu0 %vm386_vm1, %v375_v14  ;;  %v479_v25 = vstv %s705_s23  ;;  %v496_v28 = vstv %s707_s21  ;;  %s716_s22 = sld [smem:[#allocation9 + $0x80]]  ;;  %s701_s23 = sshll.u32 %s1135_s11, 1 }
  0x72   : > { %v513_v29 = vstv %s710_s15  ;;  %v486_v30 = vstv %s706_s8  ;;  %s545_s17 = sld [smem:[#allocation9]]  ;;  %s718_s21 = sshll.u32 %s1034_s28, 5 }
  0x73   : > { %v520_v36 = vstv %s1156_s14  ;;  %v527_v54 = vstv %s712_s20  ;;  %s374_s15 = scalar_lea.vmem [#allocation11], %s701_s23  ;;  %s972_s28 = smov [#allocation11]  }
  0x74   : > { %v493_v57 = vstv %s492_s9  ;;  %v539_v62 = vstv %s713_s16  ;;  %s580_s8 = sshll.u32 %s374_s15, 4  ;;  %s1165_s9 = scalar_lea.hbm %s1216_s7, %s718_s21  ;;  %s1167_s8 = int_to_ptr.vmem [resolvable:$true] %s580_s8 }
  0x75   : > { %v552_v63 = vstv %s715_s29  ;;  %v536_v1 = vstv %s535_s18  ;;  %s567_s16 = scalar_lea.sflag [#allocation4], %s1135_s11  ;;  %s888_s29 = scalar_lea.vmem %s1167_s8, 32 }
  0x76   : > { %v549_v2 = vstv %s714_s19  ;;  %p889_p13 = scmp.ne.s32.totalorder %s1167_s8, %s888_s29  ;;  %s892_s18 = sshll.u32 %s972_s28, 4  ;;  %s893_s18 = int_to_ptr.vmem [resolvable:$false] %s892_s18 }
  0x77   : > { %v559_v9 = vstv %s716_s22  ;;  %s894_s19 = scalar_lea.vmem %s893_s18, 64  ;;  %p895_p7 = scmp.lt.s32.totalorder %s1167_s8, %s893_s18 }
  0x78   : > { %v546_v12 = vstv %s545_s17  ;;  %p890_p3 = pnand %p889_p13, %p1233_p1  ;;  %p896_p11 = scmp.lt.s32.totalorder %s894_s19, %s888_s29 }
  0x7a   : > { %p891_p4 = pneg %p890_p3  ;;  %p897_p10 = por %p896_p11, %p895_p7 }
  0x7c   : > { %p898_p0 = pnand %p897_p10, %p891_p4 }
  0xe9   : > { %v384_v15 = vpop.permute.xlu0 %383 }
 0x144   : > { %v456_v16 = vpop.f32.mrb[0].mxu0 }
 0x145   : > { %v457_v17 = vadd.f32 %v456_v16, %v384_v15  ;;  %v736_v18 = vpop.f32.mrb[1].mxu0 }
 0x147   : > { %v460_v21 = vmax.f32 %v457_v17, 0.0 }
 0x149   : > { %v466_v26 = vmul.f32 %v465_v19, %v460_v21  ;;  %v473_v27 = vmul.f32 %v472_v20, %v460_v21  ;;  %v500_v31 = vmul.f32 %v499_v22, %v460_v21  ;;  %v507_v32 = vmul.f32 %v506_v23, %v460_v21 }
 0x14a   : > { %v463_v33 = vmul.f32 %v462_v24, %v460_v21  ;;  %v480_v35 = vmul.f32 %v479_v25, %v460_v21  ;;  %v497_v37 = vmul.f32 %v496_v28, %v460_v21  ;;  %v514_v39 = vmul.f32 %v513_v29, %v460_v21 }
 0x14b   : > { %v468_v34 = vrot.slane %v466_v26, 1  ;;  %v502_v38 = vrot.slane %v500_v31, 1  ;;  %v475_v41 = vrot.slane %v473_v27, 2  ;;  %v487_v42 = vmul.f32 %v486_v30, %v460_v21 }
 0x14c   : > { %v509_v44 = vrot.slane %v507_v32, 2  ;;  %v521_v45 = vmul.f32 %v520_v36, %v460_v21  ;;  %v482_v47 = vrot.slane %v480_v35, 3  ;;  %v516_v49 = vrot.slane %v514_v39, 3 }
 0x14d   : > { %v470_v40 = vadd.f32 %v468_v34, %v463_v33  ;;  %v504_v43 = vadd.f32 %v502_v38, %v497_v37  ;;  %v489_v51 = vrot.slane %v487_v42, 4 }
 0x14e   : > { %v523_v53 = vrot.slane %v521_v45, 4 }
 0x14f   : > { %v477_v46 = vadd.f32 %v475_v41, %v470_v40  ;;  %v511_v48 = vadd.f32 %v509_v44, %v504_v43 }
 0x151   : > { %v484_v50 = vadd.f32 %v482_v47, %v477_v46  ;;  %v518_v52 = vadd.f32 %v516_v49, %v511_v48 }
 0x153   : > { %v491_v55 = vadd.f32 %v489_v51, %v484_v50  ;;  %v525_v56 = vadd.f32 %v523_v53, %v518_v52 }
 0x155   : > { %v528_v58 = vadd.f32 %v527_v54, %v525_v56  ;;  %v494_v59 = vadd.f32 %v493_v57, %v491_v55 }
 0x157   : > { %v530_v60 = vrot.slane %v528_v58, 7 }
 0x159   : > { %v533_v61 = vsel %vm532_vm2, %v494_v59, %v530_v60 }
 0x15a   : > { %v534_v0 = vmax.f32 %v533_v61, 0.0 }
 0x15c   : > { %v540_v3 = vmul.f32 %v539_v62, %v534_v0  ;;  %v553_v4 = vmul.f32 %v552_v63, %v534_v0  ;;  %v537_v5 = vmul.f32 %v536_v1, %v534_v0  ;;  %v550_v7 = vmul.f32 %v549_v2, %v534_v0 }
 0x15e   : > { %v542_v6 = vrot.slane %v540_v3, 1  ;;  %v555_v8 = vrot.slane %v553_v4, 1 }
 0x160   : > { %v544_v10 = vadd.f32 %v542_v6, %v537_v5  ;;  %v557_v11 = vadd.f32 %v555_v8, %v550_v7 }
 0x162   : > { %v560_v13 = vadd.f32 %v559_v9, %v557_v11  ;;  %v547_v14 = vadd.f32 %v546_v12, %v544_v10 }
 0x164   : > { %v562_v15 = vrot.slane %v560_v13, 7 }
 0x166   : > { %v564_v16 = vsel %vm532_vm2, %v547_v14, %v562_v15 }
 0x167   : > { %565 = vst [vmem:[%s374_s15] sm:$0x3] %v564_v16 }
 0x168   : > { %901 = shalt.err (!%p898_p0)
}
 0x169   : > { %s902_s11 = scalar_lea.hbm %s1165_s9, 32  ;;  %s906_s23 = scalar_lea.hbm %s1216_s7, 96 }
 0x16a   : > { %p903_p2 = scmp.ne.s32.totalorder %s1165_s9, %s902_s11  ;;  %p907_p6 = scmp.lt.u32.totalorder %s1165_s9, %s1216_s7 }
 0x16b   : > { %p908_p12 = scmp.lt.u32.totalorder %s906_s23, %s902_s11  ;;  %p910_p13 = scmp.lt.u32.totalorder %s902_s11, %s1165_s9 }
 0x16c   : > { %p904_p8 = pnand %p903_p2, %p1233_p1 }
 0x16d   : > { %p909_p9 = por %p908_p12, %p907_p6 }
 0x16e   : > { %p905_p5 = pneg %p904_p8 }
 0x16f   : > { %p911_p3 = por %p910_p13, %p909_p9 }
 0x171   : > { %p912_p4 = pnand %p911_p3, %p905_p5 }
 0x173   : > { %915 = shalt.err (!%p912_p4)
}
 0x174   : > { %759 = dma.vmem_to_hbm [thread:$0]  (%p1233_p1), %s1167_s8, 32, %s1165_s9, %s567_s16  }
 0x175 PF: > { %p786_p7 = scmp.ge.s32.totalorder %s962_s27, 2  ;;  %s592_s14 = sand.u32 1, %s950_s24  }
 0x176   : > { %p1234_p11 = scmp.ne.s32.totalorder %s1222_s13, 0  ;;  %s593_s20 = scalar_lea.sflag [#allocation4], %s592_s14 }
 0x178   : > { %p775_p10 = pnand %p786_p7, %p1234_p11 }
 0x17a   : > { %945 = dma.done.wait (!%p775_p10), %s593_s20, 32  }
 0x17b   : > { %947 = vsyncadd (!%p775_p10), %s593_s20, 4294967264  ;;  %p20_p0 = scmp.ge.s32.totalorder %s1038_s30, 5   ;;  %s1235_s24 = smov %s954_s25 }
 0x17c   : > { %s1236_s25 = smov %s958_s26  ;;  %s1237_s26 = smov %s1050_s10 }
 0x17d   : > { %s1238_s27 = smov %s1038_s30  ;;  %22 = sbr.rel (!%p20_p0) target bundleno = 6 (0x6), region = 143 }
 0x184   :  { %598 = vsyncpa [#allocation4], 1 }
 0x185   :  { %600 = vsyncpa [#allocation4 + $0x1], 1 }
 0x186   :  { %601 = vsyncpa [#allocation5], 1 }
 0x187   :  { %603 = vsyncpa [#allocation5 + $0x1], 1 }
 0x188   :  { %604 = vsyncpa [#allocation7], 1 }
 0x189   :  { %605 = vsyncpa [#allocation10], 1 }

</bundles_post_ra>
